<compile_context>
chip_gen: v7x
topology: tpu7x:2x2x1
jax: 0.10.0
libtpu: 0.0.40
codegen_flags: <defaults>
</compile_context>

<pallas_src>
import functools

import jax
import jax.numpy as jnp
from jax.experimental import pallas as pl
from jax.experimental.pallas import tpu as pltpu

LANES = 128
SUBLANES = 8
ALIGN = LANES * SUBLANES          # kernel-prefix granularity: one (8, 128) f32 vreg
DEFAULT_TILE_ROWS = 8192          # (8192, 128) f32 tile = 4 MiB per input per buffer


@functools.lru_cache(maxsize=None)
def _num_tensorcores_per_device():
    """2 TensorCores per device on v7x; 1 on v5e / v6e (and anything unknown)."""
    try:
        kind = jax.devices()[0].device_kind.lower()
    except Exception:
        return 1
    return 2 if "v7" in kind else 1


def _msle_kernel(pred_ref, actual_ref, out_ref, acc_ref, *,
                 n_rows, tile_rows, inner_steps, num_blocks,
                 has_overhang, needs_mask):
    part = pl.program_id(0)           # partition axis (TensorCore split on v7x)
    j = pl.program_id(1)              # reduction axis
    step = part * inner_steps + j     # absolute block index

    @pl.when(j == 0)
    def _():
        acc_ref[...] = jnp.zeros_like(acc_ref)

    def accumulate(vals):
        # Pure-VALU reduction tree into the (8, 128) vreg-sized accumulator.
        # (tile_rows//8, 8, 128) is aligned to (8, 128) vreg tiles -> layout-free.
        acc_ref[...] += vals.reshape(tile_rows // SUBLANES, SUBLANES, LANES).sum(axis=0)

    def compute():
        p = jnp.maximum(pred_ref[...].astype(jnp.float32), 0.0)
        a = jnp.maximum(actual_ref[...].astype(jnp.float32), 0.0)
        # Two EUP logs (free slot); no VALU-heavy divide. Matches torch.log(clamp+1).
        d = jnp.log(1.0 + p) - jnp.log(1.0 + a)
        sq = d * d
        if needs_mask:
            @pl.when(step < num_blocks - 1)
            def _():                   # interior blocks: unmasked fast path
                accumulate(sq)

            @pl.when(step == num_blocks - 1)
            def _():                   # last real block: Pallas pads it with
                # unspecified data -> select (NOT multiply) so NaN/Inf can't leak in.
                row_ids = jax.lax.broadcasted_iota(jnp.int32, (tile_rows, LANES), 0)
                row_mask = (step * tile_rows + row_ids) < n_rows
                accumulate(jnp.where(row_mask, sq, 0.0))
        else:
            accumulate(sq)

    if has_overhang:
        # Clamped duplicate step at the tail of the last partition: skip all work.
        @pl.when(step < num_blocks)
        def _():
            compute()
    else:
        compute()

    @pl.when(j == inner_steps - 1)
    def _():
        out_ref[0, 0] = jnp.sum(acc_ref[...])


def _msle_sum_plain(pred_flat, actual_flat):
    """Plain-JAX sum of squared log-differences (used for the <=1023-element tail)."""
    p = jnp.maximum(pred_flat.astype(jnp.float32), 0.0)
    a = jnp.maximum(actual_flat.astype(jnp.float32), 0.0)
    d = jnp.log(1.0 + p) - jnp.log(1.0 + a)
    return jnp.sum(d * d)


def rmsle_loss(pred, actual, *, max_tile_rows=None, num_partitions=None):
    """Equivalent of RMSLELoss().forward(pred, actual).

    NOTE: like the PyTorch module, this returns the *MSE of the logs* (no sqrt).
    """
    assert pred.shape == actual.shape, (pred.shape, actual.shape)
    n = pred.size
    pred_flat = jnp.ravel(pred)
    actual_flat = jnp.ravel(actual)

    if max_tile_rows is None:
        max_tile_rows = DEFAULT_TILE_ROWS
    max_tile_rows = max(SUBLANES, (max_tile_rows // SUBLANES) * SUBLANES)

    # Kernel consumes the 1024-element-aligned prefix; the small tail is handled with
    # plain JAX ops (this replaces the previous jnp.pad, which copied both inputs).
    n_main = (n // ALIGN) * ALIGN
    total = jnp.float32(0.0)

    if n_main > 0:
        if n_main == n:
            pred2d = pred_flat.reshape(-1, LANES)
            actual2d = actual_flat.reshape(-1, LANES)
        else:
            pred2d = pred_flat[:n_main].reshape(-1, LANES)
            actual2d = actual_flat[:n_main].reshape(-1, LANES)

        rows = n_main // LANES                       # always a multiple of 8
        tile_rows = min(rows, max_tile_rows)         # multiple of 8 by construction
        num_blocks = pl.cdiv(rows, tile_rows)

        if num_partitions is None:
            # Split across TensorCores only where there are two of them (v7x);
            # on single-TC chips the split is pure overhead.
            num_partitions = 2 if (_num_tensorcores_per_device() >= 2
                                   and num_blocks >= 2) else 1
        n_parts = max(1, min(num_partitions, num_blocks))
        inner_steps = pl.cdiv(num_blocks, n_parts)
        has_overhang = (n_parts * inner_steps) != num_blocks
        needs_mask = (rows % tile_rows) != 0

        def block_map(part, j):
            step = part * inner_steps + j
            if has_overhang:
                # Keep the duplicated trailing step's DMA in-bounds; its
                # contribution is skipped inside the kernel.
                step = jnp.minimum(step, num_blocks - 1)
            return (step, 0)

        kernel = functools.partial(
            _msle_kernel, n_rows=rows, tile_rows=tile_rows,
            inner_steps=inner_steps, num_blocks=num_blocks,
            has_overhang=has_overhang, needs_mask=needs_mask)

        # VMEM budget: 2 inputs x 2 pipeline buffers, plus headroom for the in-kernel
        # f32 temporaries (p/a/d/sq and the last-block mask). The accumulator itself
        # is only (8, 128) f32 = 4 KiB now. Set the limit explicitly: v5e's default
        # scoped VMEM (16 MiB) is too small for 4 MiB tiles double-buffered.
        in_tile_bytes = tile_rows * LANES * jnp.dtype(pred2d.dtype).itemsize
        f32_tile_bytes = tile_rows * LANES * 4
        vmem_limit = 4 * in_tile_bytes + 6 * f32_tile_bytes + (2 << 20)
        vmem_limit = int(max(min(vmem_limit, 60 << 20), 16 << 20))

        part_sem = "parallel" if n_parts > 1 else "arbitrary"

        partial_sums = pl.pallas_call(
            kernel,
            out_shape=jax.ShapeDtypeStruct((n_parts, 1), jnp.float32),
            grid_spec=pltpu.PrefetchScalarGridSpec(
                num_scalar_prefetch=0,
                grid=(n_parts, inner_steps),
                in_specs=[
                    pl.BlockSpec((tile_rows, LANES), block_map),
                    pl.BlockSpec((tile_rows, LANES), block_map),
                ],
                out_specs=pl.BlockSpec((1, 1), lambda part, j: (part, 0),
                                       memory_space=pltpu.SMEM),
                scratch_shapes=[pltpu.VMEM((SUBLANES, LANES), jnp.float32)],
            ),
            compiler_params=pltpu.CompilerParams(
                dimension_semantics=(part_sem, "arbitrary"),
                vmem_limit_bytes=vmem_limit),
        )(pred2d, actual2d)
        total = total + jnp.sum(partial_sums)

    if n_main < n:
        total = total + _msle_sum_plain(pred_flat[n_main:], actual_flat[n_main:])

    return total / jnp.float32(n)


def msle_ref(pred, actual):
    lp = jnp.log(jnp.maximum(pred.astype(jnp.float32), 0.0) + 1.0)
    la = jnp.log(jnp.maximum(actual.astype(jnp.float32), 0.0) + 1.0)
    return jnp.mean((lp - la) ** 2)


if __name__ == "__main__":
    key = jax.random.PRNGKey(0)
    ks = jax.random.split(key, 10)

    # Primary: NCHW [2, 4, 16, 16] (negatives exercise the clamp); single-block kernel path.
    pred = jax.random.normal(ks[0], (2, 4, 16, 16), jnp.float32) * 2.0
    actual = jax.random.normal(ks[1], (2, 4, 16, 16), jnp.float32) * 2.0 + 1.0
    out = rmsle_loss(pred, actual)
    jax.block_until_ready(out)
    assert jnp.allclose(out, msle_ref(pred, actual), rtol=1e-4, atol=1e-6), (
        out, msle_ref(pred, actual))

    # Ragged, below one aligned block (555 elements): pure-JAX tail path.
    pred_r = jax.random.normal(ks[2], (3, 5, 37), jnp.float32)
    actual_r = jax.random.normal(ks[3], (3, 5, 37), jnp.float32) + 1.0
    out_r = rmsle_loss(pred_r, actual_r)
    jax.block_until_ready(out_r)
    assert jnp.allclose(out_r, msle_ref(pred_r, actual_r), rtol=1e-4, atol=1e-6)

    # Ragged above one aligned block (1887 elements): kernel prefix + JAX tail combine.
    pred_g = jax.random.normal(ks[4], (3, 17, 37), jnp.float32)
    actual_g = jax.random.normal(ks[5], (3, 17, 37), jnp.float32) + 0.5
    out_g = rmsle_loss(pred_g, actual_g)
    jax.block_until_ready(out_g)
    assert jnp.allclose(out_g, msle_ref(pred_g, actual_g), rtol=1e-4, atol=1e-6)

    # Multi-block path with a forced small tile: exercises the masked last block, the
    # 2-partition split, and the clamped/skipped overhang step on any chip generation.
    pred_b = jax.random.normal(ks[6], (4, 8, 64, 127), jnp.float32)
    actual_b = jax.random.normal(ks[7], (4, 8, 64, 127), jnp.float32) + 0.5
    out_b = rmsle_loss(pred_b, actual_b, max_tile_rows=768, num_partitions=2)
    jax.block_until_ready(out_b)
    assert jnp.allclose(out_b, msle_ref(pred_b, actual_b), rtol=1e-4, atol=1e-6)

    # bf16 inputs stream straight through (half the HBM bytes); upcast happens in-kernel.
    pred_h = (jax.random.normal(ks[8], (2, 4, 16, 16), jnp.float32) * 2.0).astype(jnp.bfloat16)
    actual_h = (jax.random.normal(ks[9], (2, 4, 16, 16), jnp.float32) + 1.0).astype(jnp.bfloat16)
    out_h = rmsle_loss(pred_h, actual_h)
    jax.block_until_ready(out_h)
    assert jnp.allclose(out_h, msle_ref(pred_h, actual_h), rtol=1e-4, atol=1e-6)

    print("KERNEL_OK")
</pallas_src>

<mosaic_0001>
module attributes {stable_mosaic.version = 11 : i64} {
  func.func @_msle_kernel(%arg0: i32, %arg1: i32, %arg2: memref<16x128xf32, #tpu.memory_space<vmem>>, %arg3: memref<16x128xf32, #tpu.memory_space<vmem>>, %arg4: memref<1x1xf32, #tpu.memory_space<smem>>, %arg5: memref<8x128xf32, #tpu.memory_space<vmem>>) attributes {dimension_semantics = [#tpu.dimension_semantics<arbitrary>, #tpu.dimension_semantics<arbitrary>], iteration_bounds = array<i64: 1, 1>, scalar_prefetch = 0 : i64, scratch_operands = 1 : i64, tpu.core_type = #tpu.core_type<tc>, window_params = [{transform_indices = @transform_0, window_bounds = array<i64: 16, 128>}, {transform_indices = @transform_1, window_bounds = array<i64: 16, 128>}, {transform_indices = @transform_2, window_bounds = array<i64: 1, 1>}]} {
    %c0_i32 = arith.constant 0 : i32
    %0 = arith.cmpi eq, %arg1, %c0_i32 : i32
    %1 = arith.extui %0 : i1 to i32
    %c0_i32_0 = arith.constant 0 : i32
    %2 = arith.cmpi ne, %1, %c0_i32_0 : i32
    scf.if %2 {
      %cst_14 = arith.constant 0.000000e+00 : f32
      %25 = vector.broadcast %cst_14 : f32 to vector<8x128xf32>
      %c0_15 = arith.constant 0 : index
      %c0_16 = arith.constant 0 : index
      %26 = vector.load %arg5[%c0_15, %c0_16] : memref<8x128xf32, #tpu.memory_space<vmem>>, vector<8x128xf32>
      tpu.vector_store %arg5[%c0_15, %c0_16], %25 {strides = array<i32>} : memref<8x128xf32, #tpu.memory_space<vmem>>, vector<8x128xf32>,
    } else {
    }
    %c0 = arith.constant 0 : index
    %c0_1 = arith.constant 0 : index
    %3 = vector.load %arg2[%c0, %c0_1] : memref<16x128xf32, #tpu.memory_space<vmem>>, vector<16x128xf32>
    %cst = arith.constant 0.000000e+00 : f32
    %4 = vector.broadcast %cst : f32 to vector<16x128xf32>
    %5 = arith.maximumf %3, %4 : vector<16x128xf32>
    %c0_2 = arith.constant 0 : index
    %c0_3 = arith.constant 0 : index
    %6 = vector.load %arg3[%c0_2, %c0_3] : memref<16x128xf32, #tpu.memory_space<vmem>>, vector<16x128xf32>
    %cst_4 = arith.constant 0.000000e+00 : f32
    %7 = vector.broadcast %cst_4 : f32 to vector<16x128xf32>
    %8 = arith.maximumf %6, %7 : vector<16x128xf32>
    %cst_5 = arith.constant 1.000000e+00 : f32
    %9 = vector.broadcast %cst_5 : f32 to vector<16x128xf32>
    %10 = arith.addf %9, %5 : vector<16x128xf32>
    %11 = math.log %10 : vector<16x128xf32>
    %cst_6 = arith.constant 1.000000e+00 : f32
    %12 = vector.broadcast %cst_6 : f32 to vector<16x128xf32>
    %13 = arith.addf %12, %8 : vector<16x128xf32>
    %14 = math.log %13 : vector<16x128xf32>
    %15 = arith.subf %11, %14 : vector<16x128xf32>
    %16 = arith.mulf %15, %15 : vector<16x128xf32>
    %c0_7 = arith.constant 0 : index
    %c0_8 = arith.constant 0 : index
    %17 = vector.load %arg5[%c0_7, %c0_8] : memref<8x128xf32, #tpu.memory_space<vmem>>, vector<8x128xf32>
    %18 = vector.shape_cast %16 : vector<16x128xf32> to vector<2x8x128xf32>
    %cst_9 = arith.constant dense<0.000000e+00> : vector<8x128xf32>
    %19 = vector.multi_reduction <add>, %18, %cst_9 [0] : vector<2x8x128xf32> to vector<8x128xf32>
    %20 = arith.addf %17, %19 : vector<8x128xf32>
    %c0_10 = arith.constant 0 : index
    %c0_11 = arith.constant 0 : index
    %21 = vector.load %arg5[%c0_10, %c0_11] : memref<8x128xf32, #tpu.memory_space<vmem>>, vector<8x128xf32>
    tpu.vector_store %arg5[%c0_10, %c0_11], %20 {strides = array<i32>} : memref<8x128xf32, #tpu.memory_space<vmem>>, vector<8x128xf32>,
    %c0_i32_12 = arith.constant 0 : i32
    %22 = arith.cmpi eq, %arg1, %c0_i32_12 : i32
    %23 = arith.extui %22 : i1 to i32
    %c0_i32_13 = arith.constant 0 : i32
    %24 = arith.cmpi ne, %23, %c0_i32_13 : i32
    scf.if %24 {
      %c0_14 = arith.constant 0 : index
      %c0_15 = arith.constant 0 : index
      %25 = vector.load %arg5[%c0_14, %c0_15] : memref<8x128xf32, #tpu.memory_space<vmem>>, vector<8x128xf32>
      %26 = vector.shape_cast %25 : vector<8x128xf32> to vector<1x8x128xf32>
      %cst_16 = arith.constant dense<0.000000e+00> : vector<1xf32>
      %27 = vector.multi_reduction <add>, %26, %cst_16 [1, 2] : vector<1x8x128xf32> to vector<1xf32>
      %28 = vector.shape_cast %27 : vector<1xf32> to vector<1x1x1xf32>
      %29 = vector.extract %28[0, 0, 0] : f32 from vector<1x1x1xf32>
      %c0_17 = arith.constant 0 : index
      %c0_18 = arith.constant 0 : index
      %30 = memref.load %arg4[%c0_17, %c0_18] : memref<1x1xf32, #tpu.memory_space<smem>>
      memref.store %29, %arg4[%c0_17, %c0_18] : memref<1x1xf32, #tpu.memory_space<smem>>
    } else {
    }
    return
  }
  func.func @transform_0(%arg0: i32, %arg1: i32) -> (i32, i32) {
    %c1_i32 = arith.constant 1 : i32
    %0 = arith.muli %arg0, %c1_i32 : i32
    %1 = arith.addi %0, %arg1 : i32
    %c0_i32 = arith.constant 0 : i32
    %c0_i32_0 = arith.constant 0 : i32
    return %1, %c0_i32 : i32, i32
  }
  func.func @transform_1(%arg0: i32, %arg1: i32) -> (i32, i32) {
    %c1_i32 = arith.constant 1 : i32
    %0 = arith.muli %arg0, %c1_i32 : i32
    %1 = arith.addi %0, %arg1 : i32
    %c0_i32 = arith.constant 0 : i32
    %c0_i32_0 = arith.constant 0 : i32
    return %1, %c0_i32 : i32, i32
  }
  func.func @transform_2(%arg0: i32, %arg1: i32) -> (i32, i32) {
    %c0_i32 = arith.constant 0 : i32
    %c0_i32_0 = arith.constant 0 : i32
    return %arg0, %c0_i32 : i32, i32
  }
}

</mosaic_0001>

<bundles_post_ra>
// kernel: tpu_custom_call.1
= control target key start
LH: loop header
LB: loop body
LE: loop exit
PB: predicated region body
PF: predicated region fallthrough
CT: control target
= control target key end

     0   :  { %7 = vsyncpa [#allocation4], 0  ;;  %s246_s0 = inlined_call_operand.hbm [shape: f32[16,128], index: 0, kind: input, shape index: {}]   ;;  %s247_s1 = inlined_call_operand.hbm [shape: f32[16,128], index: 1, kind: input, shape index: {}]   ;;  %s248_s2 = inlined_call_operand.hbm [shape: f32[1,1], index: 2, kind: output, shape index: {}]  }
   0x1   :  { %8 = vsyncpa [#allocation7], 0 }
   0x2   :  { %9 = vsyncpa [#allocation5], 0  ;;  %s190_s9 = smov [#allocation3]   ;;  %s130_s13 = scalar_lea.hbm %s246_s0, 256 }
   0x3   :  { %s19_s10 = sshll.u32 %s190_s9, 4  ;;  %p131_p0 = scmp.ne.s32.totalorder %s246_s0, %s130_s13  ;;  %s20_s10 = int_to_ptr.vmem [resolvable:$true] %s19_s10 }
   0x4   :  { %p134_p1 = scmp.lt.u32.totalorder %s130_s13, %s246_s0 }
   0x6   :  { %p136_p2 = pnand %p134_p1, %p131_p0 }
   0x8   :  { %139 = shalt.err (!%p136_p2)
}
   0x9   :  { %s140_s18 = scalar_lea.vmem %s20_s10, 256  ;;  %p145_p4 = scmp.lt.s32.totalorder %s20_s10, %s20_s10 }
   0xa   :  { %p141_p3 = scmp.ne.s32.totalorder %s20_s10, %s140_s18  ;;  %p146_p5 = scmp.lt.s32.totalorder %s140_s18, %s140_s18 }
   0xc   :  { %p147_p6 = por %p146_p5, %p145_p4 }
   0xe   :  { %p148_p7 = pnand %p147_p6, %p141_p3 }
  0x10   :  { %151 = shalt.err (!%p148_p7)
}
  0x11   :  { %s191_s19 = smov 128   ;;  %s192_s20 = smov 8  }
  0x12   :  { %25 = dma.hbm_to_vmem [thread:$0]  %s246_s0, 256, %s20_s10, [#allocation4], %s191_s19, %s191_s19, %s192_s20  }
  0x13   :  { %s193_s23 = smov [#allocation6]   ;;  %s152_s27 = scalar_lea.hbm %s247_s1, 256 }
  0x14   :  { %s35_s24 = sshll.u32 %s193_s23, 4  ;;  %p153_p8 = scmp.ne.s32.totalorder %s247_s1, %s152_s27  ;;  %s36_s24 = int_to_ptr.vmem [resolvable:$true] %s35_s24 }
  0x15   :  { %p156_p9 = scmp.lt.u32.totalorder %s152_s27, %s247_s1 }
  0x17   :  { %p158_p10 = pnand %p156_p9, %p153_p8 }
  0x19   :  { %161 = shalt.err (!%p158_p10)
}
  0x1a   :  { %s162_s4 = scalar_lea.vmem %s36_s24, 256  ;;  %p167_p12 = scmp.lt.s32.totalorder %s36_s24, %s36_s24 }
  0x1b   :  { %p163_p11 = scmp.ne.s32.totalorder %s36_s24, %s162_s4  ;;  %p168_p13 = scmp.lt.s32.totalorder %s162_s4, %s162_s4 }
  0x1d   :  { %p169_p0 = por %p168_p13, %p167_p12 }
  0x1f   :  { %p170_p1 = pnand %p169_p0, %p163_p11 }
  0x21   :  { %173 = shalt.err (!%p170_p1)
}
  0x22   :  { %41 = dma.hbm_to_vmem [thread:$0]  %s247_s1, 256, %s36_s24, [#allocation7], %s191_s19, %s191_s19, %s192_s20  }
  0x23   :  { %184 = dma.done.wait [#allocation4], 256  }
  0x24   :  { %185 = vsyncadd [#allocation4], 4294967040 }
  0x25   :  { %186 = dma.done.wait [#allocation7], 256  }
  0x26   :  { %187 = vsyncadd [#allocation7], 4294967040  ;;  %v57_v0 = vld [vmem:[#allocation3] sm:$0xff]  ;;  %v58_v1 = vld [vmem:[#allocation3 + $0x8] sm:$0xff]  ;;  %s174_s8 = scalar_lea.hbm %s248_s2, 16 }
  0x27   :  { %v61_v2 = vld [vmem:[#allocation6] sm:$0xff]  ;;  %v59_v3 = vmax.f32 %v57_v0, 0.0  ;;  %v60_v4 = vmax.f32 %v58_v1, 0.0  ;;  %v62_v5 = vld [vmem:[#allocation6 + $0x8] sm:$0xff]  ;;  %p175_p2 = scmp.ne.s32.totalorder %s248_s2, %s174_s8  ;;  %p178_p3 = scmp.lt.u32.totalorder %s174_s8, %s248_s2 }
  0x28   :  { %v63_v6 = vmax.f32 %v61_v2, 0.0  ;;  %v64_v7 = vmax.f32 %v62_v5, 0.0 }
  0x29   :  { %v65_v8 = vadd.f32 1.0, %v59_v3  ;;  %v66_v9 = vadd.f32 1.0, %v60_v4  ;;  %p180_p4 = pnand %p178_p3, %p175_p2 }
  0x2a   :  { %v71_v10 = vadd.f32 1.0, %v63_v6  ;;  %v72_v11 = vadd.f32 1.0, %v64_v7 }
  0x2b   :  { %122 = vlog2.f32 %v65_v8 }
  0x2c   :  { %124 = vlog2.f32 %v66_v9 }
  0x2d   :  { %126 = vlog2.f32 %v71_v10 }
  0x2e   :  { %128 = vlog2.f32 %v72_v11 }
  0x35   :  { %v123_v12 = vpop.eup %122 }
  0x36   :  { %v125_v13 = vpop.eup %124  ;;  %v68_v14 = vmul.f32 0.6931472, %v123_v12 }
  0x37   :  { %v127_v15 = vpop.eup %126  ;;  %v70_v16 = vmul.f32 0.6931472, %v125_v13 }
  0x38   :  { %v129_v17 = vpop.eup %128  ;;  %v74_v18 = vmul.f32 0.6931472, %v127_v15 }
  0x39   :  { %v76_v19 = vmul.f32 0.6931472, %v129_v17 }
  0x3a   :  { %v77_v20 = vsub.f32 %v68_v14, %v74_v18 }
  0x3b   :  { %v78_v21 = vsub.f32 %v70_v16, %v76_v19 }
  0x3c   :  { %v79_v22 = vmul.f32 %v77_v20, %v77_v20 }
  0x3d   :  { %v80_v23 = vmul.f32 %v78_v21, %v78_v21 }
  0x3f   :  { %v82_v24 = vadd.f32 %v80_v23, %v79_v22 }
  0x41   :  { %89 = vadd.xlane.f32.xlu0 %v82_v24 }
  0xce   :  { %v90_v25 = vpop.xlane.xlu0 %89 }
  0xcf   :  { %v91_v26 = vrot.slane %v90_v25, 4 }
  0xd1   :  { %v92_v27 = vadd.f32 %v91_v26, %v90_v25 }
  0xd3   :  { %v93_v28 = vrot.slane %v92_v27, 2 }
  0xd5   :  { %v94_v29 = vadd.f32 %v93_v28, %v92_v27 }
  0xd7   :  { %v95_v30 = vrot.slane %v94_v29, 1 }
  0xd9   :  { %v96_v31 = vadd.f32 %v95_v30, %v94_v29 }
  0xdb   :  { %115 = vpush %v96_v31 }
 0x10c   :  { %s116_s1 = spop %115 }
 0x10d   :  { %99 = sst [smem:[#allocation8]] %s116_s1 }
 0x10e   :  { %183 = shalt.err (!%p180_p4)
}
 0x10f   :  { %s194_s13 = smov [#allocation8]  }
 0x110   :  { %107 = dma.smem_to_hbm %s194_s13, 16, %s248_s2, [#allocation5]  }
 0x111   :  { %188 = dma.done.wait [#allocation5], 16  }
 0x112   :  { %189 = vsyncadd [#allocation5], 4294967280 }
 0x113   :  { %111 = sfence }
 0x114   :  { %112 = vsyncpa [#allocation4], 1 }
 0x115   :  { %113 = vsyncpa [#allocation7], 1 }
 0x116   :  { %114 = vsyncpa [#allocation5], 1 }

</bundles_post_ra>
